<compile_context>
chip_gen: v6e
topology: v6e:2x2x1
jax: 0.10.0
libtpu: 0.0.40
codegen_flags: <defaults>
</compile_context>

<pallas_src>
import functools

import jax
import jax.numpy as jnp
from jax.experimental import pallas as pl
from jax.experimental.pallas import tpu as pltpu


def _round_up(x, m):
    return (x + m - 1) // m * m


def _pick_tile_h(ho, w, m_target):
    """tile_h sized from an MXU M-target: tile_h * W ~= m_target, capped at Ho."""
    t = max(1, m_target // max(w, 1))
    return min(t, ho)


def _conv3x3_relu_kernel(x_ref, w_ref, b_ref, o_ref, *, tile_h):
    # x_ref: (H_pad, W_pad, 3*Cin)  kw-expanded image for this batch element;
    #                               block index is constant along the h grid
    #                               axis so it is DMA'd once per n and stays
    #                               resident in VMEM.
    # w_ref: (3, 3*Cin, Cout)       per-kh weight slab (kw-major, Cin-minor).
    # b_ref: (1, Cout)              bias (f32).
    # o_ref: (tile_h, W_pad, Cout)  output row tile; columns >= Wo and rows
    #                               >= Ho are don't-care (sliced in wrapper).
    _, W, C3 = x_ref.shape
    _, _, cout = o_ref.shape

    row0 = pl.multiple_of(pl.program_id(1) * tile_h, tile_h)

    acc = b_ref[...].astype(jnp.float32)               # (1, Cout), broadcasts
    # kh taps = three accumulating MXU matmuls over cheap outer-dim row
    # slices.  kw taps were folded into the channel dim by the wrapper, so
    # there is no in-kernel concat / roll / cross-lane relayout at all.
    for kh in range(3):
        lhs = x_ref[pl.ds(row0 + kh, tile_h)]           # (tile_h, W, 3*Cin)
        lhs = lhs.reshape(tile_h * W, C3)               # free: W % 8 == 0
        acc = acc + jnp.dot(lhs, w_ref[kh],
                            preferred_element_type=jnp.float32)
    acc = jnp.maximum(acc, 0.0)                         # ReLU in f32
    o_ref[...] = acc.reshape(tile_h, W, cout).astype(o_ref.dtype)


def conv3x3_relu_nhwc(x_nhwc, w_hwio, bias, *, m_target=256, compute_dtype=None):
    """relu(valid 3x3 conv), channels-last.

    x_nhwc: (N, H, W, Cin); w_hwio: (3, 3, Cin, Cout); bias: (Cout,).
    Returns (N, H-2, W-2, Cout).
    m_target: MXU M-dim target for tile_h*W (~128 on v5e, 256-512 on v6e/v7x).
    compute_dtype: optional (e.g. jnp.bfloat16): casts activations/weights;
      accumulation / bias / ReLU stay f32.
    """
    N, H, W, Cin = x_nhwc.shape
    Cout = w_hwio.shape[-1]
    assert H >= 3 and W >= 3, "valid 3x3 conv needs H, W >= 3"
    Ho, Wo = H - 2, W - 2
    out_dtype = x_nhwc.dtype

    # ---- one-time wrapper-side prep (outside the hot loop) -----------------
    # Pad W to a multiple of 8 so the in-kernel M-merge reshape is free.
    W_pad = _round_up(W, 8)
    if W_pad > W:
        x_nhwc = jnp.pad(x_nhwc, ((0, 0), (0, 0), (0, W_pad - W), (0, 0)))

    # kw expansion: x_kw[n,h,w, kw*Cin+ci] = x[n,h,w+kw,ci] (zeros past W).
    # This only affects output columns >= Wo, which are sliced off below.
    x_kw = jnp.concatenate(
        [x_nhwc,
         jnp.pad(x_nhwc[:, :, 1:, :], ((0, 0), (0, 0), (0, 1), (0, 0))),
         jnp.pad(x_nhwc[:, :, 2:, :], ((0, 0), (0, 0), (0, 2), (0, 0)))],
        axis=-1)                                        # (N, H, W_pad, 3*Cin)

    # tile_h from the MXU M-target; pad Ho so the grid divides exactly (no
    # tile_h=1 cliff for prime Ho).
    tile_h = _pick_tile_h(Ho, W_pad, m_target)
    nh = pl.cdiv(Ho, tile_h)
    Ho_pad = nh * tile_h
    H_pad = Ho_pad + 2
    if H_pad > H:
        x_kw = jnp.pad(x_kw, ((0, 0), (0, H_pad - H), (0, 0), (0, 0)))

    # Per-kh weight slabs matching the (kw-major, Cin-minor) channel order of
    # x_kw.  Cout is NOT padded: output writeback stays minimal and contiguous.
    w_slabs = w_hwio.reshape(3, 3 * Cin, Cout)
    b2 = bias.reshape(1, Cout).astype(jnp.float32)

    if compute_dtype is not None:
        x_kw = x_kw.astype(compute_dtype)
        w_slabs = w_slabs.astype(compute_dtype)

    kernel = functools.partial(_conv3x3_relu_kernel, tile_h=tile_h)

    in_itemsize = jnp.dtype(x_kw.dtype).itemsize
    out_itemsize = jnp.dtype(out_dtype).itemsize
    flops = 2 * N * Ho * Wo * 9 * Cin * Cout
    bytes_accessed = (N * H_pad * W_pad * 3 * Cin * in_itemsize
                      + 9 * Cin * Cout * in_itemsize
                      + N * Ho_pad * W_pad * Cout * out_itemsize)

    out_padded = pl.pallas_call(
        kernel,
        out_shape=jax.ShapeDtypeStruct((N, Ho_pad, W_pad, Cout), out_dtype),
        grid_spec=pltpu.PrefetchScalarGridSpec(
            num_scalar_prefetch=0,
            grid=(N, nh),
            in_specs=[
                # Full kw-expanded image per batch element; constant block
                # index along h keeps it VMEM-resident across the h steps.
                # (Switch to a halo'd row window for large images on v7x.)
                pl.BlockSpec((None, H_pad, W_pad, 3 * Cin),
                             lambda n, h: (n, 0, 0, 0)),
                pl.BlockSpec((3, 3 * Cin, Cout), lambda n, h: (0, 0, 0)),
                pl.BlockSpec((1, Cout), lambda n, h: (0, 0)),
            ],
            out_specs=pl.BlockSpec((None, tile_h, W_pad, Cout),
                                   lambda n, h: (n, h, 0, 0)),
        ),
        compiler_params=pltpu.CompilerParams(
            dimension_semantics=("parallel", "parallel"),
            # <= ~48 MiB keeps a 2-deep pipeline alive on v7x (64 MiB/TC);
            # raise toward 64-96 MiB on v5e/v6e if tiles are grown.
            vmem_limit_bytes=48 * 1024 * 1024),
        cost_estimate=pl.CostEstimate(flops=flops, transcendentals=0,
                                      bytes_accessed=bytes_accessed),
    )(x_kw, w_slabs, b2)

    # Drop padded rows / don't-care columns.
    return out_padded[:, :Ho, :Wo, :]


def conv3x3_relu(x_nchw, weight, bias, **kwargs):
    """PyTorch-equivalent API: x (N,Cin,H,W), weight (Cout,Cin,3,3), bias (Cout,).
    Returns relu(Conv2d(Cin, Cout, 3, padding=0)(x)) in NCHW.  Prefer
    conv3x3_relu_nhwc for channels-last pipelines (skips the transposes)."""
    w_hwio = jnp.transpose(weight, (2, 3, 1, 0))        # (3,3,Cin,Cout)
    x_nhwc = jnp.transpose(x_nchw, (0, 2, 3, 1))        # (N,H,W,Cin)
    out_nhwc = conv3x3_relu_nhwc(x_nhwc, w_hwio, bias, **kwargs)
    return jnp.transpose(out_nhwc, (0, 3, 1, 2))        # (N,Cout,Ho,Wo)


if __name__ == "__main__":
    key = jax.random.PRNGKey(0)
    k_x, k_w, k_b = jax.random.split(key, 3)

    N, Cin, Cout, H, W = 2, 4, 8, 16, 16
    x = jax.random.normal(k_x, (N, Cin, H, W), dtype=jnp.float32)
    # Deterministic parameter init (shapes match nn.Conv2d(4, 8, 3)).
    fan_in = Cin * 3 * 3
    bound = 1.0 / (fan_in ** 0.5)
    weight = jax.random.uniform(k_w, (Cout, Cin, 3, 3), jnp.float32,
                                minval=-bound, maxval=bound)
    bias = jax.random.uniform(k_b, (Cout,), jnp.float32,
                              minval=-bound, maxval=bound)

    out = conv3x3_relu(x, weight, bias)
    jax.block_until_ready(out)

    # Cross-check against XLA's conv for correctness.
    ref = jax.lax.conv_general_dilated(
        x, weight, window_strides=(1, 1), padding="VALID",
        dimension_numbers=("NCHW", "OIHW", "NCHW"))
    ref = jnp.maximum(ref + bias[None, :, None, None], 0.0)
    assert out.shape == (N, Cout, H - 2, W - 2)
    assert jnp.allclose(out, ref, atol=1e-5, rtol=1e-5)

    print("KERNEL_OK")
</pallas_src>

<mosaic_0001>
module attributes {stable_mosaic.version = 11 : i64} {
  func.func @_conv3x3_relu_kernel(%arg0: i32, %arg1: i32, %arg2: memref<1x16x16x12xf32, #tpu.memory_space<vmem>>, %arg3: memref<3x12x8xf32, #tpu.memory_space<vmem>>, %arg4: memref<1x8xf32, #tpu.memory_space<vmem>>, %arg5: memref<1x14x16x8xf32, #tpu.memory_space<vmem>>) attributes {dimension_semantics = [#tpu.dimension_semantics<parallel>, #tpu.dimension_semantics<parallel>], iteration_bounds = array<i64: 2, 1>, scalar_prefetch = 0 : i64, scratch_operands = 0 : i64, tpu.core_type = #tpu.core_type<tc>, window_params = [{transform_indices = @transform_0, window_bounds = array<i64: 1, 16, 16, 12>}, {pipeline_mode = #tpu.pipeline_mode<synchronous>, transform_indices = @transform_1, window_bounds = array<i64: 3, 12, 8>}, {pipeline_mode = #tpu.pipeline_mode<synchronous>, transform_indices = @transform_2, window_bounds = array<i64: 1, 8>}, {transform_indices = @transform_3, window_bounds = array<i64: 1, 14, 16, 8>}]} {
    %c14_i32 = arith.constant 14 : i32
    %0 = arith.muli %arg1, %c14_i32 : i32
    %1 = tpu.assume_multiple %0, 14 : i32
    %c0 = arith.constant 0 : index
    %c0_0 = arith.constant 0 : index
    %2 = vector.load %arg4[%c0, %c0_0] : memref<1x8xf32, #tpu.memory_space<vmem>>, vector<1x8xf32>
    %c0_i32 = arith.constant 0 : i32
    %3 = arith.addi %1, %c0_i32 : i32
    %c0_1 = arith.constant 0 : index
    %4 = arith.index_cast %3 : i32 to index
    %c0_2 = arith.constant 0 : index
    %c0_3 = arith.constant 0 : index
    %5 = vector.load %arg2[%c0_1, %4, %c0_2, %c0_3] : memref<1x16x16x12xf32, #tpu.memory_space<vmem>>, vector<1x14x16x12xf32>
    %6 = vector.shape_cast %5 : vector<1x14x16x12xf32> to vector<14x16x12xf32>
    %7 = vector.shape_cast %6 : vector<14x16x12xf32> to vector<224x12xf32>
    %c0_4 = arith.constant 0 : index
    %c0_5 = arith.constant 0 : index
    %c0_6 = arith.constant 0 : index
    %8 = vector.load %arg3[%c0_4, %c0_5, %c0_6] : memref<3x12x8xf32, #tpu.memory_space<vmem>>, vector<1x12x8xf32>
    %9 = vector.shape_cast %8 : vector<1x12x8xf32> to vector<12x8xf32>
    %cst = arith.constant dense<0.000000e+00> : vector<224x8xf32>
    %10 = tpu.matmul %7, %9, %cst {dimension_numbers = #tpu.dot_dimension_numbers<[1], [0], [0], [1], [0, 0, 1, 1], [], []>} : vector<224x12xf32>, vector<12x8xf32>, vector<224x8xf32> -> vector<224x8xf32>
    %11 = vector.broadcast %2 : vector<1x8xf32> to vector<224x8xf32>
    %12 = arith.addf %11, %10 : vector<224x8xf32>
    %c1_i32 = arith.constant 1 : i32
    %13 = arith.addi %1, %c1_i32 : i32
    %c0_7 = arith.constant 0 : index
    %14 = arith.index_cast %13 : i32 to index
    %c0_8 = arith.constant 0 : index
    %c0_9 = arith.constant 0 : index
    %15 = vector.load %arg2[%c0_7, %14, %c0_8, %c0_9] : memref<1x16x16x12xf32, #tpu.memory_space<vmem>>, vector<1x14x16x12xf32>
    %16 = vector.shape_cast %15 : vector<1x14x16x12xf32> to vector<14x16x12xf32>
    %17 = vector.shape_cast %16 : vector<14x16x12xf32> to vector<224x12xf32>
    %c1 = arith.constant 1 : index
    %c0_10 = arith.constant 0 : index
    %c0_11 = arith.constant 0 : index
    %18 = vector.load %arg3[%c1, %c0_10, %c0_11] : memref<3x12x8xf32, #tpu.memory_space<vmem>>, vector<1x12x8xf32>
    %19 = vector.shape_cast %18 : vector<1x12x8xf32> to vector<12x8xf32>
    %cst_12 = arith.constant dense<0.000000e+00> : vector<224x8xf32>
    %20 = tpu.matmul %17, %19, %cst_12 {dimension_numbers = #tpu.dot_dimension_numbers<[1], [0], [0], [1], [0, 0, 1, 1], [], []>} : vector<224x12xf32>, vector<12x8xf32>, vector<224x8xf32> -> vector<224x8xf32>
    %21 = arith.addf %12, %20 : vector<224x8xf32>
    %c2_i32 = arith.constant 2 : i32
    %22 = arith.addi %1, %c2_i32 : i32
    %c0_13 = arith.constant 0 : index
    %23 = arith.index_cast %22 : i32 to index
    %c0_14 = arith.constant 0 : index
    %c0_15 = arith.constant 0 : index
    %24 = vector.load %arg2[%c0_13, %23, %c0_14, %c0_15] : memref<1x16x16x12xf32, #tpu.memory_space<vmem>>, vector<1x14x16x12xf32>
    %25 = vector.shape_cast %24 : vector<1x14x16x12xf32> to vector<14x16x12xf32>
    %26 = vector.shape_cast %25 : vector<14x16x12xf32> to vector<224x12xf32>
    %c2 = arith.constant 2 : index
    %c0_16 = arith.constant 0 : index
    %c0_17 = arith.constant 0 : index
    %27 = vector.load %arg3[%c2, %c0_16, %c0_17] : memref<3x12x8xf32, #tpu.memory_space<vmem>>, vector<1x12x8xf32>
    %28 = vector.shape_cast %27 : vector<1x12x8xf32> to vector<12x8xf32>
    %cst_18 = arith.constant dense<0.000000e+00> : vector<224x8xf32>
    %29 = tpu.matmul %26, %28, %cst_18 {dimension_numbers = #tpu.dot_dimension_numbers<[1], [0], [0], [1], [0, 0, 1, 1], [], []>} : vector<224x12xf32>, vector<12x8xf32>, vector<224x8xf32> -> vector<224x8xf32>
    %30 = arith.addf %21, %29 : vector<224x8xf32>
    %cst_19 = arith.constant 0.000000e+00 : f32
    %31 = vector.broadcast %cst_19 : f32 to vector<224x8xf32>
    %32 = arith.maximumf %30, %31 : vector<224x8xf32>
    %33 = vector.shape_cast %32 : vector<224x8xf32> to vector<14x16x8xf32>
    %c0_20 = arith.constant 0 : index
    %c0_21 = arith.constant 0 : index
    %c0_22 = arith.constant 0 : index
    %c0_23 = arith.constant 0 : index
    %34 = vector.load %arg5[%c0_20, %c0_21, %c0_22, %c0_23] : memref<1x14x16x8xf32, #tpu.memory_space<vmem>>, vector<1x14x16x8xf32>
    %35 = vector.shape_cast %34 : vector<1x14x16x8xf32> to vector<14x16x8xf32>
    %36 = vector.shape_cast %33 : vector<14x16x8xf32> to vector<1x14x16x8xf32>
    tpu.vector_store %arg5[%c0_20, %c0_21, %c0_22, %c0_23], %36 {strides = array<i32>} : memref<1x14x16x8xf32, #tpu.memory_space<vmem>>, vector<1x14x16x8xf32>,
    return
  }
  func.func @transform_0(%arg0: i32, %arg1: i32) -> (i32, i32, i32, i32) {
    %c0_i32 = arith.constant 0 : i32
    %c0_i32_0 = arith.constant 0 : i32
    %c0_i32_1 = arith.constant 0 : i32
    %c0_i32_2 = arith.constant 0 : i32
    return %arg0, %c0_i32, %c0_i32_0, %c0_i32_1 : i32, i32, i32, i32
  }
  func.func @transform_1(%arg0: i32, %arg1: i32) -> (i32, i32, i32) {
    %c0_i32 = arith.constant 0 : i32
    %c0_i32_0 = arith.constant 0 : i32
    %c0_i32_1 = arith.constant 0 : i32
    %c0_i32_2 = arith.constant 0 : i32
    return %c0_i32, %c0_i32_0, %c0_i32_1 : i32, i32, i32
  }
  func.func @transform_2(%arg0: i32, %arg1: i32) -> (i32, i32) {
    %c0_i32 = arith.constant 0 : i32
    %c0_i32_0 = arith.constant 0 : i32
    %c0_i32_1 = arith.constant 0 : i32
    return %c0_i32, %c0_i32_0 : i32, i32
  }
  func.func @transform_3(%arg0: i32, %arg1: i32) -> (i32, i32, i32, i32) {
    %c0_i32 = arith.constant 0 : i32
    %c0_i32_0 = arith.constant 0 : i32
    %c0_i32_1 = arith.constant 0 : i32
    return %arg0, %arg1, %c0_i32, %c0_i32_0 : i32, i32, i32, i32
  }
}

</mosaic_0001>

<bundles_post_ra>
// kernel: tpu_custom_call.1
= control target key start
LH: loop header
LB: loop body
LE: loop exit
PB: predicated region body
PF: predicated region fallthrough
CT: control target
= control target key end

     0   :  { %s1880_s12 = smov 0   ;;  %s1882_s13 = smov 0   ;;  %s2254_s0 = inlined_call_operand.vmem [shape: f32[2,16,16,12], index: 0, kind: input, shape index: {}]   ;;  %s2255_s1 = inlined_call_operand.vmem [shape: f32[3,12,8], index: 1, kind: input, shape index: {}]   ;;  %s2256_s2 = inlined_call_operand.vmem [shape: f32[1,8], index: 2, kind: input, shape index: {}]   ;;  %s2257_s3 = inlined_call_operand.vmem [shape: f32[2,14,16,8], index: 3, kind: output, shape index: {}]  }
   0x1   :  { %s1884_s14 = smov 0  }
   0x2 LB: > { %s25_s15 = sadd.s32 1, %s1854_s13  ;;  %p1424_p0 = scmp.ge.s32.totalorder %s1858_s14, 1  ;;  %s1858_s14 = sphi %s1884_s14, %s13_s14   ;;  %s1854_s13 = sphi %s1882_s13, %s2259_s13   ;;  %s1850_s12 = sphi %s1880_s12, %s2258_s12  }
   0x3   : > { %p27_p1 = scmp.ge.s32.totalorder %s25_s15, 2  ;;  %p151_p2 = scmp.lt.s32.totalorder %s1858_s14, 3 }
   0x5   : > { %s2261_s15 = smov (%p27_p1, %s25_s15), 0  ;;  %p152_p3 = pnand %p1424_p0, %p151_p2 }
   0x6   : > { %p180_p4 = scmp.lt.s32.totalorder (!%p152_p3), %s1850_s12, 1 }
   0x7   : > { %155 = sbr.rel (%p152_p3) target bundleno = 301 (0x12d), region = 32 }
   0xc   : > { %v229_v0 = vld [vmem:[%s2255_s1 + $0x8] sm:$0xf]  ;;  %vm315_vm0 = vcmask 1043456   ;;  %v228_v1 = vld [vmem:[%s2255_s1] sm:$0xff]  ;;  %s2263_s12 = smov (!%p180_p4, %s1850_s12), 1  ;;  %vm230_vm1 = vcmask 97280  }
   0xd   : > { %1807 = vmatprep.subr.msk.mxu1 %vm315_vm0, %v229_v0  ;;  %1669 = vmatprep.subr.msk.mxu0 %vm315_vm0, %v229_v0  ;;  %v1487_v2 = vld [vmem:[%s2255_s1 + $0x18] sm:$0xf]  ;;  %v1546_v3 = vld [vmem:[%s2255_s1 + $0x28] sm:$0xf]  ;;  %s1578_s24 = sshll.u32 %s2263_s12, 8  ;;  %v1486_v10 = vld [vmem:[%s2255_s1 + $0x10] sm:$0xff] }
   0xe   : > { %1809 = vmatpush3.msk.msra.mxu1 %vm315_vm0, %v229_v0  ;;  %1670 = vmatpush3.msk.msra.mxu0 %vm315_vm0, %v229_v0  ;;  %s1920_s27 = scalar_lea.vmem %s2254_s0, %s1578_s24  ;;  %v1545_v11 = vld [vmem:[%s2255_s1 + $0x20] sm:$0xff]  ;;  %s1811_s7 = smul.u32 224, %s2263_s12  ;;  %vm1294_vm2 = vcmask 64512  }
   0xf   : > { %1808 = vmatprep.subr.mxu1 %v228_v1  ;;  %1671 = vmatprep.subr.mxu0 %v228_v1  ;;  %v200_v4 = vld [vmem:[%s1920_s27] sm:$0xff]  ;;  %v1926_v5 = vld [vmem:[%s1920_s27 + $0x70] sm:$0xff]  ;;  %v201_v6 = vld [vmem:[%s1920_s27 + $0x8] sm:$0xff] }
  0x10   : > { %1810 = vmatpush3.msra.mxu1 %v228_v1  ;;  %1672 = vmatpush3.msra.mxu0 %v228_v1  ;;  %v1933_v7 = vld [vmem:[%s1920_s27 + $0x78] sm:$0xff]  ;;  %v202_v8 = vld [vmem:[%s1920_s27 + $0x10] sm:$0xff]  ;;  %v1937_v9 = vld [vmem:[%s1920_s27 + $0x80] sm:$0xff]  ;;  %s2143_s10 = scalar_lea.vmem %s2257_s3, %s1811_s7 }
  0x11   : > { %1715 = vmatprep.subr.msk.mxu1 %vm315_vm0, %v1487_v2  ;;  %1761 = vmatprep.subr.msk.mxu0 %vm315_vm0, %v1546_v3  ;;  %v203_v12 = vld [vmem:[%s1920_s27 + $0x18] sm:$0xff]  ;;  %v1952_v13 = vld [vmem:[%s1920_s27 + $0x88] sm:$0xff]  ;;  %v204_v14 = vld [vmem:[%s1920_s27 + $0x20] sm:$0xff] }
  0x12   : > { %1673 = vmatprep.mubr.msk.f32.mxu0 %vm230_vm1, %v200_v4  ;;  %1694 = vmatprep.mubr.msk.f32.mxu1 %vm230_vm1, %v1926_v5  ;;  %v1959_v15 = vld [vmem:[%s1920_s27 + $0x90] sm:$0xff]  ;;  %v205_v16 = vld [vmem:[%s1920_s27 + $0x28] sm:$0xff]  ;;  %v1969_v17 = vld [vmem:[%s1920_s27 + $0x98] sm:$0xff] }
  0x13   : > { %1674 = vmatmul.mubr.msk.f32.vlgmr.msra.gmra.mxu0 %vm230_vm1, %v201_v6  ;;  %1695 = vmatmul.mubr.msk.f32.vlgmr.msra.gmra.mxu1 %vm230_vm1, %v1933_v7  ;;  %v206_v18 = vld [vmem:[%s1920_s27 + $0x30] sm:$0xff]  ;;  %v1973_v19 = vld [vmem:[%s1920_s27 + $0xa0] sm:$0xff]  ;;  %v207_v20 = vld [vmem:[%s1920_s27 + $0x38] sm:$0xff] }
  0x14   : > { %1716 = vmatpush3.msk.msra.mxu1 %vm315_vm0, %v1487_v2  ;;  %1762 = vmatpush3.msk.msra.mxu0 %vm315_vm0, %v1546_v3  ;;  %v1983_v21 = vld [vmem:[%s1920_s27 + $0xa8] sm:$0xff]  ;;  %v208_v22 = vld [vmem:[%s1920_s27 + $0x40] sm:$0xff]  ;;  %v1987_v23 = vld [vmem:[%s1920_s27 + $0xb0] sm:$0xff] }
  0x15   : > { %1676 = vmatprep.mubr.msk.f32.mxu0 %vm230_vm1, %v202_v8  ;;  %1697 = vmatprep.mubr.msk.f32.mxu1 %vm230_vm1, %v1937_v9  ;;  %v209_v24 = vld [vmem:[%s1920_s27 + $0x48] sm:$0xff]  ;;  %v223_v25 = vld [vmem:[%s1920_s27 + $0xb8] sm:$0xff]  ;;  %v210_v26 = vld [vmem:[%s1920_s27 + $0x50] sm:$0xff] }
  0x16   : > { %1717 = vmatprep.subr.mxu1 %v1486_v10  ;;  %1763 = vmatprep.subr.mxu0 %v1545_v11  ;;  %v224_v27 = vld [vmem:[%s1920_s27 + $0xc0] sm:$0xff]  ;;  %v211_v28 = vld [vmem:[%s1920_s27 + $0x58] sm:$0xff]  ;;  %v225_v29 = vld [vmem:[%s1920_s27 + $0xc8] sm:$0xff] }
  0x17   : > { %1677 = vmatmul.mubr.msk.f32.gmra.mxu0 %vm230_vm1, %v203_v12  ;;  %1698 = vmatmul.mubr.msk.f32.gmra.mxu1 %vm230_vm1, %v1952_v13  ;;  %v212_v30 = vld [vmem:[%s1920_s27 + $0x60] sm:$0xff]  ;;  %v226_v31 = vld [vmem:[%s1920_s27 + $0xd0] sm:$0xff]  ;;  %v213_v32 = vld [vmem:[%s1920_s27 + $0x68] sm:$0xff] }
  0x18   : > { %1679 = vmatprep.mubr.msk.f32.mxu0 %vm230_vm1, %v204_v14  ;;  %1700 = vmatprep.mubr.msk.f32.mxu1 %vm230_vm1, %v1959_v15  ;;  %v227_v33 = vld [vmem:[%s1920_s27 + $0xd8] sm:$0xff]  ;;  %v1541_v34 = vld [vmem:[%s1920_s27 + $0xe0] sm:$0xff]  ;;  %v1542_v35 = vld [vmem:[%s1920_s27 + $0xe8] sm:$0xff] }
  0x19   : > { %1718 = vmatpush3.msra.mxu1 %v1486_v10  ;;  %1764 = vmatpush3.msra.mxu0 %v1545_v11  ;;  %v1543_v36 = vld [vmem:[%s1920_s27 + $0xf0] sm:$0xff]  ;;  %v1544_v37 = vld [vmem:[%s1920_s27 + $0xf8] sm:$0xff]  ;;  %v2130_v0 = vld [vmem:[%s2256_s2] ss:$0 sm:$0xff] }
  0x1b   : > { %1680 = vmatmul.mubr.msk.f32.gmra.mxu0 %vm230_vm1, %v205_v16  ;;  %1701 = vmatmul.mubr.msk.f32.gmra.mxu1 %vm230_vm1, %v1969_v17 }
  0x1c   : > { %1682 = vmatprep.mubr.msk.f32.mxu0 %vm230_vm1, %v206_v18  ;;  %1703 = vmatprep.mubr.msk.f32.mxu1 %vm230_vm1, %v1973_v19 }
  0x1f   : > { %1683 = vmatmul.mubr.msk.f32.gmra.mxu0 %vm230_vm1, %v207_v20  ;;  %1704 = vmatmul.mubr.msk.f32.gmra.mxu1 %vm230_vm1, %v1983_v21 }
  0x20   : > { %1685 = vmatprep.mubr.msk.f32.mxu0 %vm230_vm1, %v208_v22  ;;  %1706 = vmatprep.mubr.msk.f32.mxu1 %vm230_vm1, %v1987_v23 }
  0x23   : > { %1686 = vmatmul.mubr.msk.f32.gmra.mxu0 %vm230_vm1, %v209_v24  ;;  %1707 = vmatmul.mubr.msk.f32.gmra.mxu1 %vm230_vm1, %v223_v25 }
  0x24   : > { %1688 = vmatprep.mubr.msk.f32.mxu0 %vm230_vm1, %v210_v26  ;;  %1709 = vmatprep.mubr.msk.f32.mxu1 %vm230_vm1, %v224_v27 }
  0x27   : > { %1689 = vmatmul.mubr.msk.f32.gmra.mxu0 %vm230_vm1, %v211_v28  ;;  %1710 = vmatmul.mubr.msk.f32.gmra.mxu1 %vm230_vm1, %v225_v29 }
  0x28   : > { %1691 = vmatprep.mubr.msk.f32.mxu0 %vm230_vm1, %v212_v30  ;;  %1712 = vmatprep.mubr.msk.f32.mxu1 %vm230_vm1, %v226_v31 }
  0x2b   : > { %1692 = vmatmul.mubr.msk.f32.gmra.mxu0 %vm230_vm1, %v213_v32  ;;  %1713 = vmatmul.mubr.msk.f32.gmra.mxu1 %vm230_vm1, %v227_v33 }
  0x2c   : > { %1719 = vmatprep.mubr.msk.f32.mxu1 %vm230_vm1, %v202_v8  ;;  %1765 = vmatprep.mubr.msk.f32.mxu0 %vm230_vm1, %v204_v14 }
  0x2f   : > { %1720 = vmatmul.mubr.msk.f32.vlgmr.msra.gmra.mxu1 %vm230_vm1, %v203_v12  ;;  %1766 = vmatmul.mubr.msk.f32.vlgmr.msra.gmra.mxu0 %vm230_vm1, %v205_v16 }
  0x30   : > { %1722 = vmatprep.mubr.msk.f32.mxu1 %vm230_vm1, %v204_v14  ;;  %1768 = vmatprep.mubr.msk.f32.mxu0 %vm230_vm1, %v206_v18 }
  0x33   : > { %1723 = vmatmul.mubr.msk.f32.gmra.mxu1 %vm230_vm1, %v205_v16  ;;  %1769 = vmatmul.mubr.msk.f32.gmra.mxu0 %vm230_vm1, %v207_v20 }
  0x34   : > { %1725 = vmatprep.mubr.msk.f32.mxu1 %vm230_vm1, %v206_v18  ;;  %1771 = vmatprep.mubr.msk.f32.mxu0 %vm230_vm1, %v208_v22 }
  0x37   : > { %1726 = vmatmul.mubr.msk.f32.gmra.mxu1 %vm230_vm1, %v207_v20  ;;  %1772 = vmatmul.mubr.msk.f32.gmra.mxu0 %vm230_vm1, %v209_v24 }
  0x38   : > { %1728 = vmatprep.mubr.msk.f32.mxu1 %vm230_vm1, %v208_v22  ;;  %1774 = vmatprep.mubr.msk.f32.mxu0 %vm230_vm1, %v210_v26 }
  0x3b   : > { %1729 = vmatmul.mubr.msk.f32.gmra.mxu1 %vm230_vm1, %v209_v24  ;;  %1775 = vmatmul.mubr.msk.f32.gmra.mxu0 %vm230_vm1, %v211_v28 }
  0x3c   : > { %1731 = vmatprep.mubr.msk.f32.mxu1 %vm230_vm1, %v210_v26  ;;  %1777 = vmatprep.mubr.msk.f32.mxu0 %vm230_vm1, %v212_v30 }
  0x3f   : > { %1732 = vmatmul.mubr.msk.f32.gmra.mxu1 %vm230_vm1, %v211_v28  ;;  %1778 = vmatmul.mubr.msk.f32.gmra.mxu0 %vm230_vm1, %v213_v32 }
  0x40   : > { %1734 = vmatprep.mubr.msk.f32.mxu1 %vm230_vm1, %v212_v30  ;;  %1780 = vmatprep.mubr.msk.f32.mxu0 %vm230_vm1, %v1926_v5 }
  0x43   : > { %1735 = vmatmul.mubr.msk.f32.gmra.mxu1 %vm230_vm1, %v213_v32  ;;  %1781 = vmatmul.mubr.msk.f32.gmra.mxu0 %vm230_vm1, %v1933_v7 }
  0x44   : > { %1737 = vmatprep.mubr.msk.f32.mxu1 %vm230_vm1, %v1926_v5  ;;  %1783 = vmatprep.mubr.msk.f32.mxu0 %vm230_vm1, %v1937_v9 }
  0x47   : > { %1738 = vmatmul.mubr.msk.f32.gmra.mxu1 %vm230_vm1, %v1933_v7  ;;  %1784 = vmatmul.mubr.msk.f32.gmra.mxu0 %vm230_vm1, %v1952_v13 }
  0x48   : > { %1740 = vmatprep.mubr.msk.f32.mxu1 %vm230_vm1, %v1937_v9  ;;  %1786 = vmatprep.mubr.msk.f32.mxu0 %vm230_vm1, %v1959_v15 }
  0x4b   : > { %1741 = vmatmul.mubr.msk.f32.gmra.mxu1 %vm230_vm1, %v1952_v13  ;;  %1787 = vmatmul.mubr.msk.f32.gmra.mxu0 %vm230_vm1, %v1969_v17 }
  0x4c   : > { %1743 = vmatprep.mubr.msk.f32.mxu1 %vm230_vm1, %v1959_v15  ;;  %1789 = vmatprep.mubr.msk.f32.mxu0 %vm230_vm1, %v1973_v19 }
  0x4f   : > { %1744 = vmatmul.mubr.msk.f32.gmra.mxu1 %vm230_vm1, %v1969_v17  ;;  %1790 = vmatmul.mubr.msk.f32.gmra.mxu0 %vm230_vm1, %v1983_v21 }
  0x50   : > { %1746 = vmatprep.mubr.msk.f32.mxu1 %vm230_vm1, %v1973_v19  ;;  %1792 = vmatprep.mubr.msk.f32.mxu0 %vm230_vm1, %v1987_v23 }
  0x53   : > { %1747 = vmatmul.mubr.msk.f32.gmra.mxu1 %vm230_vm1, %v1983_v21  ;;  %1793 = vmatmul.mubr.msk.f32.gmra.mxu0 %vm230_vm1, %v223_v25 }
  0x54   : > { %1749 = vmatprep.mubr.msk.f32.mxu1 %vm230_vm1, %v1987_v23  ;;  %1795 = vmatprep.mubr.msk.f32.mxu0 %vm230_vm1, %v224_v27 }
  0x57   : > { %1750 = vmatmul.mubr.msk.f32.gmra.mxu1 %vm230_vm1, %v223_v25  ;;  %1796 = vmatmul.mubr.msk.f32.gmra.mxu0 %vm230_vm1, %v225_v29 }
  0x58   : > { %1752 = vmatprep.mubr.msk.f32.mxu1 %vm230_vm1, %v224_v27  ;;  %1798 = vmatprep.mubr.msk.f32.mxu0 %vm230_vm1, %v226_v31 }
  0x5b   : > { %1753 = vmatmul.mubr.msk.f32.gmra.mxu1 %vm230_vm1, %v225_v29  ;;  %1799 = vmatmul.mubr.msk.f32.gmra.mxu0 %vm230_vm1, %v227_v33 }
  0x5c   : > { %1755 = vmatprep.mubr.msk.f32.mxu1 %vm230_vm1, %v226_v31  ;;  %1801 = vmatprep.mubr.msk.f32.mxu0 %vm230_vm1, %v1541_v34 }
  0x5f   : > { %1756 = vmatmul.mubr.msk.f32.gmra.mxu1 %vm230_vm1, %v227_v33  ;;  %1802 = vmatmul.mubr.msk.f32.gmra.mxu0 %vm230_vm1, %v1542_v35 }
  0x60   : > { %1758 = vmatprep.mubr.msk.f32.mxu1 %vm230_vm1, %v1541_v34  ;;  %1804 = vmatprep.mubr.msk.f32.mxu0 %vm230_vm1, %v1543_v36 }
  0x63   : > { %1759 = vmatmul.mubr.msk.f32.gmra.mxu1 %vm230_vm1, %v1542_v35  ;;  %1805 = vmatmul.mubr.msk.f32.gmra.mxu0 %vm230_vm1, %v1544_v37 }
  0xd3   : > { %v1675_v38 = vpop.f32.mrf.mxu0  ;;  %v2093_v39 = vpop.f32.mrf.mxu1 }
  0xd4   : > { %v531_v3 = vadd.f32 %v1675_v38, %v2130_v0 }
  0xd5   : > { %v385_v40 = vpop.f32.mrf.mxu0  ;;  %v2095_v41 = vpop.f32.mrf.mxu1 }
  0xd6   : > { %v530_v6 = vadd.f32 %v2130_v0, %v385_v40 }
  0xd7   : > { %v1678_v42 = vpop.f32.mrf.mxu0  ;;  %v2097_v43 = vpop.f32.mrf.mxu1 }
  0xd8   : > { %v533_v10 = vadd.f32 %v1678_v42, %v2130_v0 }
  0xd9   : > { %v395_v44 = vpop.f32.mrf.mxu0  ;;  %v2099_v45 = vpop.f32.mrf.mxu1 }
  0xda   : > { %v532_v15 = vadd.f32 %v2130_v0, %v395_v44 }
  0xdb   : > { %v1681_v46 = vpop.f32.mrf.mxu0  ;;  %v2101_v47 = vpop.f32.mrf.mxu1 }
  0xdc   : > { %v535_v21 = vadd.f32 %v1681_v46, %v2130_v0 }
  0xdd   : > { %v405_v48 = vpop.f32.mrf.mxu0  ;;  %v2103_v49 = vpop.f32.mrf.mxu1 }
  0xde   : > { %v534_v27 = vadd.f32 %v2130_v0, %v405_v48 }
  0xdf   : > { %v1684_v50 = vpop.f32.mrf.mxu0  ;;  %v2105_v51 = vpop.f32.mrf.mxu1 }
  0xe0   : > { %v537_v33 = vadd.f32 %v1684_v50, %v2130_v0 }
  0xe1   : > { %v415_v52 = vpop.f32.mrf.mxu0  ;;  %v2107_v53 = vpop.f32.mrf.mxu1 }
  0xe2   : > { %v536_v40 = vadd.f32 %v2130_v0, %v415_v52 }
  0xe3   : > { %v1687_v54 = vpop.f32.mrf.mxu0  ;;  %v2109_v55 = vpop.f32.mrf.mxu1 }
  0xe4   : > { %v539_v50 = vadd.f32 %v1687_v54, %v2130_v0 }
  0xe5   : > { %v2111_v56 = vpop.f32.mrf.mxu0  ;;  %v2113_v57 = vpop.f32.mrf.mxu1 }
  0xe6   : > { %v538_v52 = vadd.f32 %v2130_v0, %v2111_v56 }
  0xe7   : > { %v2115_v58 = vpop.f32.mrf.mxu0  ;;  %v2117_v59 = vpop.f32.mrf.mxu1 }
  0xe8   : > { %v541_v54 = vadd.f32 %v2115_v58, %v2130_v0 }
  0xe9   : > { %v2119_v60 = vpop.f32.mrf.mxu0  ;;  %v2121_v61 = vpop.f32.mrf.mxu1 }
  0xea   : > { %v540_v56 = vadd.f32 %v2130_v0, %v2119_v60 }
  0xeb   : > { %v2123_v62 = vpop.f32.mrf.mxu0  ;;  %v2125_v63 = vpop.f32.mrf.mxu1 }
  0xec   : > { %v543_v58 = vadd.f32 %v2123_v62, %v2130_v0  ;;  %v545_v62 = vadd.f32 %v2093_v39, %v2130_v0  ;;  %v547_v39 = vadd.f32 %v2097_v43, %v2130_v0  ;;  %v549_v43 = vadd.f32 %v2101_v47, %v2130_v0 }
  0xed   : > { %v2132_v1 = vpop.f32.mrf.mxu0  ;;  %v2134_v2 = vpop.f32.mrf.mxu1  ;;  %v551_v47 = vadd.f32 %v2105_v51, %v2130_v0  ;;  %v553_v51 = vadd.f32 %v2109_v55, %v2130_v0  ;;  %v555_v55 = vadd.f32 %v2117_v59, %v2130_v0  ;;  %v557_v59 = vadd.f32 %v2125_v63, %v2130_v0 }
  0xee   : > { %v542_v60 = vadd.f32 %v2130_v0, %v2132_v1  ;;  %v544_v1 = vadd.f32 %v2130_v0, %v2095_v41  ;;  %v546_v41 = vadd.f32 %v2130_v0, %v2099_v45  ;;  %v548_v45 = vadd.f32 %v2130_v0, %v2103_v49 }
  0xef   : > { %v1721_v4 = vpop.f32.mrf.mxu1  ;;  %v1767_v5 = vpop.f32.mrf.mxu0  ;;  %v550_v49 = vadd.f32 %v2130_v0, %v2107_v53  ;;  %v552_v53 = vadd.f32 %v2130_v0, %v2113_v57  ;;  %v554_v57 = vadd.f32 %v2130_v0, %v2121_v61 }
  0xf0   : > { %v885_v7 = vadd.f32 %v1721_v4, %v531_v3 }
  0xf1   : > { %v745_v8 = vpop.f32.mrf.mxu1  ;;  %v1099_v9 = vpop.f32.mrf.mxu0 }
  0xf2   : > { %v1239_v11 = vadd.f32 %v1767_v5, %v885_v7  ;;  %v884_v12 = vadd.f32 %v745_v8, %v530_v6 }
  0xf3   : > { %v1724_v13 = vpop.f32.mrf.mxu1  ;;  %v1770_v14 = vpop.f32.mrf.mxu0 }
  0xf4   : > { %v1267_v16 = vmax.f32 %v1239_v11, 0.0  ;;  %v1238_v17 = vadd.f32 %v1099_v9, %v884_v12  ;;  %v887_v18 = vadd.f32 %v1724_v13, %v533_v10 }
  0xf5   : > { %v755_v19 = vpop.f32.mrf.mxu1  ;;  %v1109_v20 = vpop.f32.mrf.mxu0 }
  0xf6   : > { %1296 = vst.msk [vmem:[%s2143_s10 + $0x8] sm:$0xff] %vm1294_vm2, %v1267_v16  ;;  %v1266_v22 = vmax.f32 %v1238_v17, 0.0  ;;  %v1241_v23 = vadd.f32 %v1770_v14, %v887_v18  ;;  %v886_v24 = vadd.f32 %v755_v19, %v532_v15 }
  0xf7   : > { %v1727_v25 = vpop.f32.mrf.mxu1  ;;  %v1773_v26 = vpop.f32.mrf.mxu0 }
  0xf8   : > { %1295 = vst.msk [vmem:[%s2143_s10] sm:$0xff] %vm1294_vm2, %v1266_v22  ;;  %v1269_v28 = vmax.f32 %v1241_v23, 0.0  ;;  %v1240_v29 = vadd.f32 %v1109_v20, %v886_v24  ;;  %v889_v30 = vadd.f32 %v1727_v25, %v535_v21 }
  0xf9   : > { %v765_v31 = vpop.f32.mrf.mxu1  ;;  %v1119_v32 = vpop.f32.mrf.mxu0 }
  0xfa   : > { %1298 = vst.msk [vmem:[%s2143_s10 + $0x18] sm:$0xff] %vm1294_vm2, %v1269_v28  ;;  %v1268_v34 = vmax.f32 %v1240_v29, 0.0  ;;  %v1243_v35 = vadd.f32 %v1773_v26, %v889_v30  ;;  %v888_v36 = vadd.f32 %v765_v31, %v534_v27 }
  0xfb   : > { %v1730_v37 = vpop.f32.mrf.mxu1  ;;  %v1776_v38 = vpop.f32.mrf.mxu0 }
  0xfc   : > { %1297 = vst.msk [vmem:[%s2143_s10 + $0x10] sm:$0xff] %vm1294_vm2, %v1268_v34  ;;  %v1271_v42 = vmax.f32 %v1243_v35, 0.0  ;;  %v1242_v44 = vadd.f32 %v1119_v32, %v888_v36  ;;  %v891_v46 = vadd.f32 %v1730_v37, %v537_v33 }
  0xfd   : > { %v775_v48 = vpop.f32.mrf.mxu1  ;;  %v1129_v3 = vpop.f32.mrf.mxu0 }
  0xfe   : > { %1300 = vst.msk [vmem:[%s2143_s10 + $0x28] sm:$0xff] %vm1294_vm2, %v1271_v42  ;;  %v1270_v4 = vmax.f32 %v1242_v44, 0.0  ;;  %v1245_v5 = vadd.f32 %v1776_v38, %v891_v46  ;;  %v890_v6 = vadd.f32 %v775_v48, %v536_v40 }
  0xff   : > { %v1733_v7 = vpop.f32.mrf.mxu1  ;;  %v1779_v8 = vpop.f32.mrf.mxu0 }
 0x100   : > { %1299 = vst.msk [vmem:[%s2143_s10 + $0x20] sm:$0xff] %vm1294_vm2, %v1270_v4  ;;  %v1273_v9 = vmax.f32 %v1245_v5, 0.0  ;;  %v1244_v10 = vadd.f32 %v1129_v3, %v890_v6  ;;  %v893_v11 = vadd.f32 %v1733_v7, %v539_v50 }
 0x101   : > { %v785_v12 = vpop.f32.mrf.mxu1  ;;  %v1139_v13 = vpop.f32.mrf.mxu0 }
 0x102   : > { %1302 = vst.msk [vmem:[%s2143_s10 + $0x38] sm:$0xff] %vm1294_vm2, %v1273_v9  ;;  %v1272_v14 = vmax.f32 %v1244_v10, 0.0  ;;  %v1247_v15 = vadd.f32 %v1779_v8, %v893_v11  ;;  %v892_v16 = vadd.f32 %v785_v12, %v538_v52 }
 0x103   : > { %v1736_v17 = vpop.f32.mrf.mxu1  ;;  %v1782_v18 = vpop.f32.mrf.mxu0 }
 0x104   : > { %1301 = vst.msk [vmem:[%s2143_s10 + $0x30] sm:$0xff] %vm1294_vm2, %v1272_v14  ;;  %v1275_v19 = vmax.f32 %v1247_v15, 0.0  ;;  %v1246_v20 = vadd.f32 %v1139_v13, %v892_v16  ;;  %v895_v21 = vadd.f32 %v1736_v17, %v541_v54 }
 0x105   : > { %v795_v22 = vpop.f32.mrf.mxu1  ;;  %v1149_v23 = vpop.f32.mrf.mxu0 }
 0x106   : > { %1304 = vst.msk [vmem:[%s2143_s10 + $0x48] sm:$0xff] %vm1294_vm2, %v1275_v19  ;;  %v1274_v24 = vmax.f32 %v1246_v20, 0.0  ;;  %v1249_v25 = vadd.f32 %v1782_v18, %v895_v21  ;;  %v894_v26 = vadd.f32 %v795_v22, %v540_v56 }
 0x107   : > { %v1739_v27 = vpop.f32.mrf.mxu1  ;;  %v1785_v28 = vpop.f32.mrf.mxu0 }
 0x108   : > { %1303 = vst.msk [vmem:[%s2143_s10 + $0x40] sm:$0xff] %vm1294_vm2, %v1274_v24  ;;  %v1277_v29 = vmax.f32 %v1249_v25, 0.0  ;;  %v1248_v30 = vadd.f32 %v1149_v23, %v894_v26  ;;  %v897_v31 = vadd.f32 %v1739_v27, %v543_v58 }
 0x109   : > { %v805_v32 = vpop.f32.mrf.mxu1  ;;  %v1159_v33 = vpop.f32.mrf.mxu0 }
 0x10a   : > { %1306 = vst.msk [vmem:[%s2143_s10 + $0x58] sm:$0xff] %vm1294_vm2, %v1277_v29  ;;  %v1276_v34 = vmax.f32 %v1248_v30, 0.0  ;;  %v1251_v35 = vadd.f32 %v1785_v28, %v897_v31  ;;  %v896_v36 = vadd.f32 %v805_v32, %v542_v60 }
 0x10b   : > { %v1742_v37 = vpop.f32.mrf.mxu1  ;;  %v1788_v38 = vpop.f32.mrf.mxu0 }
 0x10c   : > { %1305 = vst.msk [vmem:[%s2143_s10 + $0x50] sm:$0xff] %vm1294_vm2, %v1276_v34  ;;  %v1279_v40 = vmax.f32 %v1251_v35, 0.0  ;;  %v1250_v42 = vadd.f32 %v1159_v33, %v896_v36  ;;  %v899_v44 = vadd.f32 %v1742_v37, %v545_v62 }
 0x10d   : > { %v815_v46 = vpop.f32.mrf.mxu1  ;;  %v1169_v48 = vpop.f32.mrf.mxu0 }
 0x10e   : > { %1308 = vst.msk [vmem:[%s2143_s10 + $0x68] sm:$0xff] %vm1294_vm2, %v1279_v40  ;;  %v1278_v3 = vmax.f32 %v1250_v42, 0.0  ;;  %v1253_v50 = vadd.f32 %v1788_v38, %v899_v44  ;;  %v898_v4 = vadd.f32 %v815_v46, %v544_v1 }
 0x10f   : > { %v1745_v5 = vpop.f32.mrf.mxu1  ;;  %v1791_v6 = vpop.f32.mrf.mxu0 }
 0x110   : > { %1307 = vst.msk [vmem:[%s2143_s10 + $0x60] sm:$0xff] %vm1294_vm2, %v1278_v3  ;;  %v1281_v7 = vmax.f32 %v1253_v50, 0.0  ;;  %v1252_v8 = vadd.f32 %v1169_v48, %v898_v4  ;;  %v901_v52 = vadd.f32 %v1745_v5, %v547_v39 }
 0x111   : > { %v825_v9 = vpop.f32.mrf.mxu1  ;;  %v1179_v10 = vpop.f32.mrf.mxu0 }
 0x112   : > { %1310 = vst.msk [vmem:[%s2143_s10 + $0x78] sm:$0xff] %vm1294_vm2, %v1281_v7  ;;  %v1280_v11 = vmax.f32 %v1252_v8, 0.0  ;;  %v1255_v12 = vadd.f32 %v1791_v6, %v901_v52  ;;  %v900_v13 = vadd.f32 %v825_v9, %v546_v41  ;;  %v556_v6 = vadd.f32 %v2130_v0, %v2134_v2 }
 0x113   : > { %v1748_v54 = vpop.f32.mrf.mxu1  ;;  %v1794_v14 = vpop.f32.mrf.mxu0 }
 0x114   : > { %1309 = vst.msk [vmem:[%s2143_s10 + $0x70] sm:$0xff] %vm1294_vm2, %v1280_v11  ;;  %v1283_v15 = vmax.f32 %v1255_v12, 0.0  ;;  %v1254_v16 = vadd.f32 %v1179_v10, %v900_v13  ;;  %v903_v17 = vadd.f32 %v1748_v54, %v549_v43 }
 0x115   : > { %v835_v18 = vpop.f32.mrf.mxu1  ;;  %v1189_v56 = vpop.f32.mrf.mxu0 }
 0x116   : > { %1312 = vst.msk [vmem:[%s2143_s10 + $0x88] sm:$0xff] %vm1294_vm2, %v1283_v15  ;;  %v1282_v19 = vmax.f32 %v1254_v16, 0.0  ;;  %v1257_v20 = vadd.f32 %v1794_v14, %v903_v17  ;;  %v902_v21 = vadd.f32 %v835_v18, %v548_v45 }
 0x117   : > { %v1751_v22 = vpop.f32.mrf.mxu1  ;;  %v1797_v23 = vpop.f32.mrf.mxu0 }
 0x118   : > { %1311 = vst.msk [vmem:[%s2143_s10 + $0x80] sm:$0xff] %vm1294_vm2, %v1282_v19  ;;  %v1285_v58 = vmax.f32 %v1257_v20, 0.0  ;;  %v1256_v24 = vadd.f32 %v1189_v56, %v902_v21  ;;  %v905_v25 = vadd.f32 %v1751_v22, %v551_v47 }
 0x119   : > { %v845_v26 = vpop.f32.mrf.mxu1  ;;  %v1199_v27 = vpop.f32.mrf.mxu0 }
 0x11a   : > { %1314 = vst.msk [vmem:[%s2143_s10 + $0x98] sm:$0xff] %vm1294_vm2, %v1285_v58  ;;  %v1284_v28 = vmax.f32 %v1256_v24, 0.0  ;;  %v1259_v60 = vadd.f32 %v1797_v23, %v905_v25  ;;  %v904_v29 = vadd.f32 %v845_v26, %v550_v49 }
 0x11b   : > { %v1754_v30 = vpop.f32.mrf.mxu1  ;;  %v1800_v31 = vpop.f32.mrf.mxu0 }
 0x11c   : > { %1313 = vst.msk [vmem:[%s2143_s10 + $0x90] sm:$0xff] %vm1294_vm2, %v1284_v28  ;;  %v1287_v32 = vmax.f32 %v1259_v60, 0.0  ;;  %v1258_v33 = vadd.f32 %v1199_v27, %v904_v29  ;;  %v907_v62 = vadd.f32 %v1754_v30, %v553_v51 }
 0x11d   : > { %v855_v34 = vpop.f32.mrf.mxu1  ;;  %v1209_v35 = vpop.f32.mrf.mxu0 }
 0x11e   : > { %1316 = vst.msk [vmem:[%s2143_s10 + $0xa8] sm:$0xff] %vm1294_vm2, %v1287_v32  ;;  %v1286_v36 = vmax.f32 %v1258_v33, 0.0  ;;  %v1261_v37 = vadd.f32 %v1800_v31, %v907_v62  ;;  %v906_v38 = vadd.f32 %v855_v34, %v552_v53 }
 0x11f   : > { %v1757_v1 = vpop.f32.mrf.mxu1  ;;  %v1803_v40 = vpop.f32.mrf.mxu0 }
 0x120   : > { %1315 = vst.msk [vmem:[%s2143_s10 + $0xa0] sm:$0xff] %vm1294_vm2, %v1286_v36  ;;  %v1289_v42 = vmax.f32 %v1261_v37, 0.0  ;;  %v1260_v44 = vadd.f32 %v1209_v35, %v906_v38  ;;  %v909_v46 = vadd.f32 %v1757_v1, %v555_v55 }
 0x121   : > { %v865_v48 = vpop.f32.mrf.mxu1  ;;  %v1219_v39 = vpop.f32.mrf.mxu0 }
 0x122   : > { %1318 = vst.msk [vmem:[%s2143_s10 + $0xb8] sm:$0xff] %vm1294_vm2, %v1289_v42  ;;  %v1288_v3 = vmax.f32 %v1260_v44, 0.0  ;;  %v1263_v50 = vadd.f32 %v1803_v40, %v909_v46  ;;  %v908_v4 = vadd.f32 %v865_v48, %v554_v57 }
 0x123   : > { %v1760_v5 = vpop.f32.mrf.mxu1  ;;  %v1806_v61 = vpop.f32.mrf.mxu0 }
 0x124   : > { %1317 = vst.msk [vmem:[%s2143_s10 + $0xb0] sm:$0xff] %vm1294_vm2, %v1288_v3  ;;  %v1291_v41 = vmax.f32 %v1263_v50, 0.0  ;;  %v1262_v7 = vadd.f32 %v1219_v39, %v908_v4  ;;  %v911_v8 = vadd.f32 %v1760_v5, %v557_v59 }
 0x125   : > { %v875_v52 = vpop.f32.mrf.mxu1  ;;  %v1229_v43 = vpop.f32.mrf.mxu0 }
 0x126   : > { %1320 = vst.msk [vmem:[%s2143_s10 + $0xc8] sm:$0xff] %vm1294_vm2, %v1291_v41  ;;  %v1290_v63 = vmax.f32 %v1262_v7, 0.0  ;;  %v1265_v9 = vadd.f32 %v1806_v61, %v911_v8  ;;  %v910_v10 = vadd.f32 %v875_v52, %v556_v6 }
 0x128   : > { %1319 = vst.msk [vmem:[%s2143_s10 + $0xc0] sm:$0xff] %vm1294_vm2, %v1290_v63  ;;  %v1293_v11 = vmax.f32 %v1265_v9, 0.0  ;;  %v1264_v12 = vadd.f32 %v1229_v43, %v910_v10 }
 0x12a   : > { %1322 = vst.msk [vmem:[%s2143_s10 + $0xd8] sm:$0xff] %vm1294_vm2, %v1293_v11  ;;  %v1292_v0 = vmax.f32 %v1264_v12, 0.0 }
 0x12c   : > { %1321 = vst.msk [vmem:[%s2143_s10 + $0xd0] sm:$0xff] %vm1294_vm2, %v1292_v0 }
 0x12d PF: > { %s13_s14 = sadd.s32 1, %s1858_s14   ;;  %s2258_s12 = smov %s1854_s13 }
 0x12e   : > { %p10_p5 = scmp.ge.s32.totalorder %s13_s14, 4   ;;  %s2259_s13 = smov %s2261_s15 }
 0x130   :  { %12 = sbr.rel (!%p10_p5) target bundleno = 2 (0x2), region = 67 }

</bundles_post_ra>
